<compile_context>
chip_gen: v6e
topology: v6e:2x2x1
jax: 0.10.0
libtpu: 0.0.40
codegen_flags: <defaults>
</compile_context>

<pallas_src>
import jax
import jax.numpy as jnp
from jax import lax
from jax.experimental import pallas as pl
from jax.experimental.pallas import tpu as pltpu


def siamese_kernel(g_ref, h_ref, w1t_ref, b1_ref, w2t_ref, out_ref):
    """Fused Siamese forward for one batch tile.

    g_ref, h_ref : (bm, D_IN)  pooled graph features, natural row-major layout
    w1t_ref      : (HID, D_IN) layer-1 weight (pre-transposed, shared tower, resident)
    b1_ref       : (HID, 1)    layer-1 bias column
    w2t_ref      : (EMB, HID)  layer-2 weight (pre-transposed, resident)
    out_ref      : (1, bm)     per-pair Euclidean distance (lane-dense row)
    """
    w1t = w1t_ref[...]
    b1 = b1_ref[...]

    # (1) Layer 1, both towers, sharing the resident W1^T.  Contract over D_IN
    #     (last dim of BOTH operands — the q@k^T MXU-native form) so the batch
    #     lands directly on the lane axis with no transpose/concat/slice.
    dn = (((1,), (1,)), ((), ()))                 # contract lhs dim1 with rhs dim1
    z_g = lax.dot_general(w1t, g_ref[...], dn, preferred_element_type=jnp.float32)
    z_h = lax.dot_general(w1t, h_ref[...], dn, preferred_element_type=jnp.float32)

    # (2) Bias + ReLU per tower, then layer 2 applied ONCE to the hidden diff
    #     (linearity: gx - hx = W2^T @ (relu(z_g) - relu(z_h)); b2 cancels).
    hdiff = jnp.maximum(z_g + b1, 0.0) - jnp.maximum(z_h + b1, 0.0)          # (HID, bm)
    ediff = jnp.dot(w2t_ref[...], hdiff, preferred_element_type=jnp.float32)  # (EMB, bm)

    # (3) Sublane reduction -> lane-dense (1, bm) distance row (unmasked
    #     full-lane stores whenever bm is a multiple of 128).  Forward-only:
    #     sqrt grad at 0 is infinite; add an eps before ever differentiating.
    out_ref[...] = jnp.sqrt(jnp.sum(ediff * ediff, axis=0, keepdims=True))


def siamese_forward(g, h, w1, b1, w2, b2=None, *, bm=1024):
    """dist[i] = || MLP(g[i]) - MLP(h[i]) ||_2, fused in one pallas_call.

    g, h: (B, D_IN) pooled graph features (f32, natural layout — streamed as-is).
    w1: (D_IN, HID), b1: (1, HID), w2: (HID, EMB).  b2 is accepted for API
    parity with the module but provably cancels in the distance.
    """
    del b2  # (x @ W2 + b2) - (y @ W2 + b2) = (x - y) @ W2
    B, D_IN = g.shape
    HID = w1.shape[1]
    EMB = w2.shape[1]
    assert h.shape == (B, D_IN)
    assert bm % 128 == 0, "tile width must stay a lane multiple for dense stores"

    # Small batches: ONE exact-fit block (grid=(1,), no padding/masking) —
    # optimal on single-TC v5e/v6e.  Large batches: tile at bm; a ragged
    # trailing block (B % bm != 0) is handled by Pallas boundary masking
    # (unspecified padded input rows only feed output lanes whose stores are
    # dropped), so no jnp.pad copy of the streaming inputs is ever made.
    # On v7x prefer a bm for which pl.cdiv(B, bm) is even (two TensorCores).
    bm_eff = bm if B > bm else B
    grid = (pl.cdiv(B, bm_eff),)

    # Resident operands: transposed/reshaped once in the wrapper (tiny), DMA'd
    # once (constant index_map), used in MXU-native orientation, no per-step casts.
    w1t = w1.T                              # (HID, D_IN)
    w2t = w2.T                              # (EMB, HID)
    b1c = jnp.reshape(b1, (HID, 1))         # (HID, 1) column bias

    out = pl.pallas_call(
        siamese_kernel,
        out_shape=jax.ShapeDtypeStruct((1, B), jnp.float32),
        grid=grid,
        in_specs=[
            pl.BlockSpec((bm_eff, D_IN), lambda i: (i, 0)),    # g batch tile (natural)
            pl.BlockSpec((bm_eff, D_IN), lambda i: (i, 0)),    # h batch tile (natural)
            pl.BlockSpec((HID, D_IN), lambda i: (0, 0)),       # W1^T (resident)
            pl.BlockSpec((HID, 1), lambda i: (0, 0)),          # b1 column (resident)
            pl.BlockSpec((EMB, HID), lambda i: (0, 0)),        # W2^T (resident)
        ],
        out_specs=pl.BlockSpec((1, bm_eff), lambda i: (0, i)),  # lane-dense distances
        compiler_params=pltpu.CompilerParams(
            dimension_semantics=("parallel",)),  # batch tiles shard across v7x TCs
    )(g, h, w1t, b1c, w2t)
    return out[0]


def reference_forward(g, h, w1, b1, w2, b2):
    """Plain-JAX f32 reference (matches torch semantics, b2 included)."""
    def embed(x):
        return jnp.maximum(x @ w1 + b1, 0.0) @ w2 + b2
    gx, hx = embed(g), embed(h)
    return jnp.sqrt(jnp.sum((gx - hx) ** 2, axis=-1))


if __name__ == "__main__":
    key = jax.random.PRNGKey(0)
    kg, kh, k1, k2, k3, k4 = jax.random.split(key, 6)

    # Small synthetic problem consistent with the GREED MLP embedding dims.
    B, D_IN, HID, EMB = 300, 32, 32, 32

    g = jax.random.normal(kg, (B, D_IN), dtype=jnp.float32)
    h = jax.random.normal(kh, (B, D_IN), dtype=jnp.float32)
    w1 = jax.random.normal(k1, (D_IN, HID), dtype=jnp.float32) * 0.1
    b1 = jax.random.normal(k2, (1, HID), dtype=jnp.float32) * 0.01
    w2 = jax.random.normal(k3, (HID, EMB), dtype=jnp.float32) * 0.1
    b2 = jax.random.normal(k4, (1, EMB), dtype=jnp.float32) * 0.01

    ref = reference_forward(g, h, w1, b1, w2, b2)

    # Case 1: B <= bm -> single exact-fit block, grid=(1,), no padding at all.
    dist = jax.block_until_ready(siamese_forward(g, h, w1, b1, w2, b2))
    assert dist.shape == (B,), dist.shape
    assert jnp.allclose(dist, ref, atol=2e-2, rtol=2e-2), float(
        jnp.max(jnp.abs(dist - ref)))

    # Case 2: multi-step "parallel" grid (B=256, bm=128 -> grid=(2,), exact fit).
    dist2 = jax.block_until_ready(
        siamese_forward(g[:256], h[:256], w1, b1, w2, b2, bm=128))
    assert dist2.shape == (256,), dist2.shape
    assert jnp.allclose(dist2, ref[:256], atol=2e-2, rtol=2e-2), float(
        jnp.max(jnp.abs(dist2 - ref[:256])))

    print("KERNEL_OK")
</pallas_src>

<mosaic_0001>
module attributes {stable_mosaic.version = 11 : i64} {
  func.func @siamese_kernel(%arg0: i32, %arg1: memref<300x32xf32, #tpu.memory_space<vmem>>, %arg2: memref<300x32xf32, #tpu.memory_space<vmem>>, %arg3: memref<32x32xf32, #tpu.memory_space<vmem>>, %arg4: memref<32x1xf32, #tpu.memory_space<vmem>>, %arg5: memref<32x32xf32, #tpu.memory_space<vmem>>, %arg6: memref<1x300xf32, #tpu.memory_space<vmem>>) attributes {dimension_semantics = [#tpu.dimension_semantics<parallel>], iteration_bounds = array<i64: 1>, scalar_prefetch = 0 : i64, scratch_operands = 0 : i64, tpu.core_type = #tpu.core_type<tc>, window_params = [{transform_indices = @transform_0, window_bounds = array<i64: 300, 32>}, {transform_indices = @transform_1, window_bounds = array<i64: 300, 32>}, {pipeline_mode = #tpu.pipeline_mode<synchronous>, transform_indices = @transform_2, window_bounds = array<i64: 32, 32>}, {pipeline_mode = #tpu.pipeline_mode<synchronous>, transform_indices = @transform_3, window_bounds = array<i64: 32, 1>}, {pipeline_mode = #tpu.pipeline_mode<synchronous>, transform_indices = @transform_4, window_bounds = array<i64: 32, 32>}, {transform_indices = @transform_5, window_bounds = array<i64: 1, 300>}]} {
    %c0 = arith.constant 0 : index
    %c0_0 = arith.constant 0 : index
    %0 = vector.load %arg3[%c0, %c0_0] : memref<32x32xf32, #tpu.memory_space<vmem>>, vector<32x32xf32>
    %c0_1 = arith.constant 0 : index
    %c0_2 = arith.constant 0 : index
    %1 = vector.load %arg4[%c0_1, %c0_2] : memref<32x1xf32, #tpu.memory_space<vmem>>, vector<32x1xf32>
    %c0_3 = arith.constant 0 : index
    %c0_4 = arith.constant 0 : index
    %2 = vector.load %arg1[%c0_3, %c0_4] : memref<300x32xf32, #tpu.memory_space<vmem>>, vector<300x32xf32>
    %cst = arith.constant dense<0.000000e+00> : vector<32x300xf32>
    %3 = tpu.matmul %0, %2, %cst {dimension_numbers = #tpu.dot_dimension_numbers<[1], [1], [0], [0], [0, 0, 1, 0], [], []>} : vector<32x32xf32>, vector<300x32xf32>, vector<32x300xf32> -> vector<32x300xf32>
    %c0_5 = arith.constant 0 : index
    %c0_6 = arith.constant 0 : index
    %4 = vector.load %arg2[%c0_5, %c0_6] : memref<300x32xf32, #tpu.memory_space<vmem>>, vector<300x32xf32>
    %cst_7 = arith.constant dense<0.000000e+00> : vector<32x300xf32>
    %5 = tpu.matmul %0, %4, %cst_7 {dimension_numbers = #tpu.dot_dimension_numbers<[1], [1], [0], [0], [0, 0, 1, 0], [], []>} : vector<32x32xf32>, vector<300x32xf32>, vector<32x300xf32> -> vector<32x300xf32>
    %6 = vector.broadcast %1 : vector<32x1xf32> to vector<32x300xf32>
    %7 = arith.addf %3, %6 : vector<32x300xf32>
    %cst_8 = arith.constant 0.000000e+00 : f32
    %8 = vector.broadcast %cst_8 : f32 to vector<32x300xf32>
    %9 = arith.maximumf %7, %8 : vector<32x300xf32>
    %10 = vector.broadcast %1 : vector<32x1xf32> to vector<32x300xf32>
    %11 = arith.addf %5, %10 : vector<32x300xf32>
    %cst_9 = arith.constant 0.000000e+00 : f32
    %12 = vector.broadcast %cst_9 : f32 to vector<32x300xf32>
    %13 = arith.maximumf %11, %12 : vector<32x300xf32>
    %14 = arith.subf %9, %13 : vector<32x300xf32>
    %c0_10 = arith.constant 0 : index
    %c0_11 = arith.constant 0 : index
    %15 = vector.load %arg5[%c0_10, %c0_11] : memref<32x32xf32, #tpu.memory_space<vmem>>, vector<32x32xf32>
    %cst_12 = arith.constant dense<0.000000e+00> : vector<32x300xf32>
    %16 = tpu.matmul %15, %14, %cst_12 {dimension_numbers = #tpu.dot_dimension_numbers<[1], [0], [0], [1], [0, 0, 1, 1], [], []>} : vector<32x32xf32>, vector<32x300xf32>, vector<32x300xf32> -> vector<32x300xf32>
    %17 = arith.mulf %16, %16 : vector<32x300xf32>
    %cst_13 = arith.constant dense<0.000000e+00> : vector<300xf32>
    %18 = vector.multi_reduction <add>, %17, %cst_13 [0] : vector<32x300xf32> to vector<300xf32>
    %19 = vector.shape_cast %18 : vector<300xf32> to vector<1x300xf32>
    %20 = math.sqrt %19 : vector<1x300xf32>
    %c0_14 = arith.constant 0 : index
    %c0_15 = arith.constant 0 : index
    %21 = vector.load %arg6[%c0_14, %c0_15] : memref<1x300xf32, #tpu.memory_space<vmem>>, vector<1x300xf32>
    tpu.vector_store %arg6[%c0_14, %c0_15], %20 {strides = array<i32>} : memref<1x300xf32, #tpu.memory_space<vmem>>, vector<1x300xf32>,
    return
  }
  func.func @transform_0(%arg0: i32) -> (i32, i32) {
    %c0_i32 = arith.constant 0 : i32
    %c0_i32_0 = arith.constant 0 : i32
    return %arg0, %c0_i32 : i32, i32
  }
  func.func @transform_1(%arg0: i32) -> (i32, i32) {
    %c0_i32 = arith.constant 0 : i32
    %c0_i32_0 = arith.constant 0 : i32
    return %arg0, %c0_i32 : i32, i32
  }
  func.func @transform_2(%arg0: i32) -> (i32, i32) {
    %c0_i32 = arith.constant 0 : i32
    %c0_i32_0 = arith.constant 0 : i32
    %c0_i32_1 = arith.constant 0 : i32
    return %c0_i32, %c0_i32_0 : i32, i32
  }
  func.func @transform_3(%arg0: i32) -> (i32, i32) {
    %c0_i32 = arith.constant 0 : i32
    %c0_i32_0 = arith.constant 0 : i32
    %c0_i32_1 = arith.constant 0 : i32
    return %c0_i32, %c0_i32_0 : i32, i32
  }
  func.func @transform_4(%arg0: i32) -> (i32, i32) {
    %c0_i32 = arith.constant 0 : i32
    %c0_i32_0 = arith.constant 0 : i32
    %c0_i32_1 = arith.constant 0 : i32
    return %c0_i32, %c0_i32_0 : i32, i32
  }
  func.func @transform_5(%arg0: i32) -> (i32, i32) {
    %c0_i32 = arith.constant 0 : i32
    %c0_i32_0 = arith.constant 0 : i32
    return %c0_i32, %arg0 : i32, i32
  }
}

</mosaic_0001>

<bundles_post_ra>
// kernel: tpu_custom_call.1
= control target key start
LH: loop header
LB: loop body
LE: loop exit
PB: predicated region body
PF: predicated region fallthrough
CT: control target
= control target key end

     0   :  { %vm125_vm0 = vcmask 261120   ;;  %v1343_v8 = vmov 0   ;;  %s1810_s0 = inlined_call_operand.vmem [shape: f32[300,32], index: 0, kind: input, shape index: {}]   ;;  %s1811_s1 = inlined_call_operand.vmem [shape: f32[300,32], index: 1, kind: input, shape index: {}]   ;;  %s1812_s2 = inlined_call_operand.vmem [shape: f32[32,32], index: 2, kind: input, shape index: {}]   ;;  %s1813_s3 = inlined_call_operand.vmem [shape: f32[32,1], index: 3, kind: input, shape index: {}]   ;;  %s1814_s4 = inlined_call_operand.vmem [shape: f32[32,32], index: 4, kind: input, shape index: {}]   ;;  %s1815_s5 = inlined_call_operand.hbm [shape: f32[1,300], index: 5, kind: output, shape index: {}]  }
   0x1   :  { %v60_v0 = vld [vmem:[%s1810_s0 + $0xf8] sm:$0xff]  ;;  %v66_v1 = vld [vmem:[%s1810_s0 + $0x128] sm:$0xf]  ;;  %v59_v3 = vld [vmem:[%s1810_s0 + $0xf0] sm:$0xff]  ;;  %1314 = vset.pattern.permute.xlu1 %v1343_v8  ;;  %1313 = vset.pattern.permute.xlu0 %v1343_v8 }
   0x2   :  { %v44_v2 = vld [vmem:[%s1810_s0 + $0x78] sm:$0xff]  ;;  %1151 = vmatprep.subr.msk.mxu0 %vm125_vm0, %v60_v0  ;;  %1259 = vmatprep.subr.msk.mxu1 %vm125_vm0, %v66_v1  ;;  %v65_v4 = vld [vmem:[%s1810_s0 + $0x120] sm:$0xff]  ;;  %v43_v5 = vld [vmem:[%s1810_s0 + $0x70] sm:$0xff] }
   0x3   :  { %1152 = vmatpush3.xpose.msk.msra.mxu0 %vm125_vm0, %v44_v2  ;;  %1260 = vmatpush3.xpose.msk.msra.mxu1 %vm125_vm0, %v66_v1  ;;  %v58_v6 = vld [vmem:[%s1810_s0 + $0xe8] sm:$0xff]  ;;  %v64_v7 = vld [vmem:[%s1810_s0 + $0x118] sm:$0xff]  ;;  %v1412_v9 = vld [vmem:[%s1812_s2] sm:$0xff] }
   0x4   :  { %1153 = vmatprep.subr.msk.mxu0 %vm125_vm0, %v59_v3  ;;  %1261 = vmatprep.subr.msk.mxu1 %vm125_vm0, %v65_v4  ;;  %v42_v10 = vld [vmem:[%s1810_s0 + $0x68] sm:$0xff]  ;;  %v57_v11 = vld [vmem:[%s1810_s0 + $0xe0] sm:$0xff]  ;;  %v63_v12 = vld [vmem:[%s1810_s0 + $0x110] sm:$0xff] }
   0x5   :  { %1271 = vmatprep.mubr.msk.f32.mxu1 %vm125_vm0, %v1412_v9  ;;  %1183 = vmatprep.mubr.msk.f32.mxu0 %vm125_vm0, %v1412_v9  ;;  %v41_v13 = vld [vmem:[%s1810_s0 + $0x60] sm:$0xff]  ;;  %v56_v14 = vld [vmem:[%s1810_s0 + $0xd8] sm:$0xff]  ;;  %v62_v15 = vld [vmem:[%s1810_s0 + $0x108] sm:$0xff] }
   0x6   :  { %v40_v16 = vld [vmem:[%s1810_s0 + $0x58] sm:$0xff]  ;;  %v55_v17 = vld [vmem:[%s1810_s0 + $0xd0] sm:$0xff]  ;;  %v61_v18 = vld [vmem:[%s1810_s0 + $0x100] sm:$0xff] }
   0x7   :  { %1154 = vmatpush3.xpose.msk.msra.mxu0 %vm125_vm0, %v43_v5  ;;  %1262 = vmatpush3.xpose.msk.msra.mxu1 %vm125_vm0, %v65_v4  ;;  %v39_v19 = vld [vmem:[%s1810_s0 + $0x50] sm:$0xff]  ;;  %v54_v20 = vld [vmem:[%s1810_s0 + $0xc8] sm:$0xff]  ;;  %v98_v21 = vld [vmem:[%s1811_s1 + $0xf8] sm:$0xff] }
   0x8   :  { %1155 = vmatprep.subr.msk.mxu0 %vm125_vm0, %v58_v6  ;;  %1263 = vmatprep.subr.msk.mxu1 %vm125_vm0, %v64_v7  ;;  %v1473_v22 = vld [vmem:[%s1812_s2 + $0x8] sm:$0xff]  ;;  %v82_v24 = vld [vmem:[%s1811_s1 + $0x78] sm:$0xff]  ;;  %v53_v25 = vld [vmem:[%s1810_s0 + $0xc0] sm:$0xff] }
   0x9   :  { %v38_v23 = vld [vmem:[%s1810_s0 + $0x48] sm:$0xff]  ;;  %v97_v26 = vld [vmem:[%s1811_s1 + $0xf0] sm:$0xff]  ;;  %v37_v27 = vld [vmem:[%s1810_s0 + $0x40] sm:$0xff] }
   0xa   :  { %v1499_v28 = vld [vmem:[%s1812_s2 + $0x18] sm:$0xff]  ;;  %v26_v29 = vld [vmem:[%s1813_s3 + $0x8] sm:$0xff]  ;;  %v81_v30 = vld [vmem:[%s1811_s1 + $0x70] sm:$0xff] }
   0xb   :  { %1156 = vmatpush3.xpose.msk.msra.mxu0 %vm125_vm0, %v42_v10  ;;  %1264 = vmatpush3.xpose.msk.msra.mxu1 %vm125_vm0, %v64_v7  ;;  %v1512_v31 = vld [vmem:[%s1812_s2 + $0x10] sm:$0xff]  ;;  %v28_v32 = vld [vmem:[%s1813_s3 + $0x18] sm:$0xff]  ;;  %v96_v34 = vld [vmem:[%s1811_s1 + $0xe8] sm:$0xff] }
   0xc   :  { %1157 = vmatprep.subr.msk.mxu0 %vm125_vm0, %v57_v11  ;;  %1265 = vmatprep.subr.msk.mxu1 %vm125_vm0, %v63_v12  ;;  %v52_v33 = vld [vmem:[%s1810_s0 + $0xb8] sm:$0xff] }
   0xd   :  { %112 = vperm.xlu1 %1314, %v26_v29  }
   0xf   :  { %1158 = vmatpush3.xpose.msk.msra.mxu0 %vm125_vm0, %v41_v13  ;;  %1266 = vmatpush3.xpose.msk.msra.mxu1 %vm125_vm0, %v63_v12 }
  0x10   :  { %1159 = vmatprep.subr.msk.mxu0 %vm125_vm0, %v56_v14  ;;  %1267 = vmatprep.subr.msk.mxu1 %vm125_vm0, %v62_v15 }
  0x13   :  { %1160 = vmatpush3.xpose.msk.msra.mxu0 %vm125_vm0, %v40_v16  ;;  %1268 = vmatpush3.xpose.msk.msra.mxu1 %vm125_vm0, %v62_v15 }
  0x14   :  { %1161 = vmatprep.subr.msk.mxu0 %vm125_vm0, %v55_v17  ;;  %1269 = vmatprep.subr.msk.mxu1 %vm125_vm0, %v61_v18 }
  0x17   :  { %1162 = vmatpush3.xpose.msk.msra.mxu0 %vm125_vm0, %v39_v19  ;;  %1270 = vmatpush3.xpose.msk.msra.mxu1 %vm125_vm0, %v61_v18 }
  0x18   :  { %1163 = vmatprep.subr.msk.mxu0 %vm125_vm0, %v54_v20  ;;  %1201 = vmatprep.subr.msk.mxu1 %vm125_vm0, %v98_v21 }
  0x1a   :  { %1272 = vmatmul.mubr.msk.f32.vlgmr.msra.gmra.mxu1 %vm125_vm0, %v1473_v22 }
  0x1b   :  { %1164 = vmatpush3.xpose.msk.msra.mxu0 %vm125_vm0, %v38_v23  ;;  %1202 = vmatpush3.xpose.msk.msra.mxu1 %vm125_vm0, %v82_v24 }
  0x1c   :  { %1165 = vmatprep.subr.msk.mxu0 %vm125_vm0, %v53_v25  ;;  %1203 = vmatprep.subr.msk.mxu1 %vm125_vm0, %v97_v26 }
  0x1d   :  { %1274 = vmatprep.mubr.msk.f32.mxu1 %vm125_vm0, %v1512_v31 }
  0x1e   :  { %10 = vsyncpa [#allocation3], 0  ;;  %1275 = vmatmul.mubr.msk.f32.gmra.mxu1 %vm125_vm0, %v1499_v28  ;;  %v25_v35 = vld [vmem:[%s1813_s3] sm:$0xff]  ;;  %122 = vperm.xlu0 %1313, %v28_v32   ;;  %v27_v36 = vld [vmem:[%s1813_s3 + $0x10] sm:$0xff]  ;;  %vm970_vm1 = vcmask 359424  }
  0x1f   :  { %1166 = vmatpush3.xpose.msk.msra.mxu0 %vm125_vm0, %v37_v27  ;;  %1204 = vmatpush3.xpose.msk.msra.mxu1 %vm125_vm0, %v81_v30  ;;  %v36_v37 = vld [vmem:[%s1810_s0 + $0x38] sm:$0xff]  ;;  %v80_v38 = vld [vmem:[%s1811_s1 + $0x68] sm:$0xff]  ;;  %v51_v39 = vld [vmem:[%s1810_s0 + $0xb0] sm:$0xff] }
  0x20   :  { %1167 = vmatprep.subr.msk.mxu0 %vm125_vm0, %v52_v33  ;;  %1205 = vmatprep.subr.msk.mxu1 %vm125_vm0, %v96_v34  ;;  %v95_v40 = vld [vmem:[%s1811_s1 + $0xe0] sm:$0xff]  ;;  %v35_v41 = vld [vmem:[%s1810_s0 + $0x30] sm:$0xff]  ;;  %v50_v43 = vld [vmem:[%s1810_s0 + $0xa8] sm:$0xff] }
  0x21   :  { %1233 = vmatprep.mubr.msk.f32.mxu1 %vm125_vm0, %v1412_v9  ;;  %107 = vperm.xlu1 %1314, %v25_v35   ;;  %v79_v42 = vld [vmem:[%s1811_s1 + $0x60] sm:$0xff]  ;;  %v94_v44 = vld [vmem:[%s1811_s1 + $0xd8] sm:$0xff]  ;;  %v34_v45 = vld [vmem:[%s1810_s0 + $0x28] sm:$0xff] }
  0x22   :  { %117 = vperm.xlu0 %1313, %v27_v36   ;;  %v78_v46 = vld [vmem:[%s1811_s1 + $0x58] sm:$0xff]  ;;  %v49_v47 = vld [vmem:[%s1810_s0 + $0xa0] sm:$0xff]  ;;  %v93_v48 = vld [vmem:[%s1811_s1 + $0xd0] sm:$0xff] }
  0x23   :  { %1168 = vmatpush3.xpose.msk.msra.mxu0 %vm125_vm0, %v36_v37  ;;  %1206 = vmatpush3.xpose.msk.msra.mxu1 %vm125_vm0, %v80_v38  ;;  %v33_v49 = vld [vmem:[%s1810_s0 + $0x20] sm:$0xff]  ;;  %v77_v50 = vld [vmem:[%s1811_s1 + $0x50] sm:$0xff]  ;;  %v48_v51 = vld [vmem:[%s1810_s0 + $0x98] sm:$0xff] }
  0x24   :  { %1169 = vmatprep.subr.msk.mxu0 %vm125_vm0, %v51_v39  ;;  %1207 = vmatprep.subr.msk.mxu1 %vm125_vm0, %v95_v40  ;;  %v92_v52 = vld [vmem:[%s1811_s1 + $0xc8] sm:$0xff]  ;;  %v32_v53 = vld [vmem:[%s1810_s0 + $0x18] sm:$0xff]  ;;  %v47_v55 = vld [vmem:[%s1810_s0 + $0x90] sm:$0xff] }
  0x25   :  { %v76_v54 = vld [vmem:[%s1811_s1 + $0x48] sm:$0xff]  ;;  %v91_v56 = vld [vmem:[%s1811_s1 + $0xc0] sm:$0xff]  ;;  %v31_v57 = vld [vmem:[%s1810_s0 + $0x10] sm:$0xff] }
  0x26   :  { %v75_v58 = vld [vmem:[%s1811_s1 + $0x40] sm:$0xff]  ;;  %v46_v59 = vld [vmem:[%s1810_s0 + $0x88] sm:$0xff]  ;;  %v90_v60 = vld [vmem:[%s1811_s1 + $0xb8] sm:$0xff] }
  0x27   :  { %1170 = vmatpush3.xpose.msk.msra.mxu0 %vm125_vm0, %v35_v41  ;;  %1208 = vmatpush3.xpose.msk.msra.mxu1 %vm125_vm0, %v79_v42  ;;  %v30_v61 = vld [vmem:[%s1810_s0 + $0x8] sm:$0xff]  ;;  %v74_v62 = vld [vmem:[%s1811_s1 + $0x38] sm:$0xff]  ;;  %v45_v63 = vld [vmem:[%s1810_s0 + $0x80] sm:$0xff] }
  0x28   :  { %1171 = vmatprep.subr.msk.mxu0 %vm125_vm0, %v50_v43  ;;  %1209 = vmatprep.subr.msk.mxu1 %vm125_vm0, %v94_v44  ;;  %v89_v0 = vld [vmem:[%s1811_s1 + $0xb0] sm:$0xff]  ;;  %v29_v1 = vld [vmem:[%s1810_s0] sm:$0xff]  ;;  %v88_v3 = vld [vmem:[%s1811_s1 + $0xa8] sm:$0xff] }
  0x29   :  { %v73_v2 = vld [vmem:[%s1811_s1 + $0x30] sm:$0xff]  ;;  %v104_v4 = vld [vmem:[%s1811_s1 + $0x128] sm:$0xf]  ;;  %v87_v6 = vld [vmem:[%s1811_s1 + $0xa0] sm:$0xff] }
  0x2a   :  { %v72_v5 = vld [vmem:[%s1811_s1 + $0x28] sm:$0xff]  ;;  %v103_v7 = vld [vmem:[%s1811_s1 + $0x120] sm:$0xff]  ;;  %v86_v10 = vld [vmem:[%s1811_s1 + $0x98] sm:$0xff] }
  0x2b   :  { %1172 = vmatpush3.xpose.msk.msra.mxu0 %vm125_vm0, %v34_v45  ;;  %1210 = vmatpush3.xpose.msk.msra.mxu1 %vm125_vm0, %v78_v46  ;;  %v71_v8 = vld [vmem:[%s1811_s1 + $0x20] sm:$0xff]  ;;  %v102_v11 = vld [vmem:[%s1811_s1 + $0x118] sm:$0xff]  ;;  %v85_v13 = vld [vmem:[%s1811_s1 + $0x90] sm:$0xff] }
  0x2c   :  { %1173 = vmatprep.subr.msk.mxu0 %vm125_vm0, %v49_v47  ;;  %1211 = vmatprep.subr.msk.mxu1 %vm125_vm0, %v93_v48  ;;  %v70_v12 = vld [vmem:[%s1811_s1 + $0x18] sm:$0xff]  ;;  %v101_v14 = vld [vmem:[%s1811_s1 + $0x110] sm:$0xff]  ;;  %v84_v16 = vld [vmem:[%s1811_s1 + $0x88] sm:$0xff] }
  0x2d   :  { %v69_v15 = vld [vmem:[%s1811_s1 + $0x10] sm:$0xff]  ;;  %v100_v17 = vld [vmem:[%s1811_s1 + $0x108] sm:$0xff]  ;;  %v83_v19 = vld [vmem:[%s1811_s1 + $0x80] sm:$0xff] }
  0x2e   :  { %v68_v18 = vld [vmem:[%s1811_s1 + $0x8] sm:$0xff]  ;;  %v99_v20 = vld [vmem:[%s1811_s1 + $0x100] sm:$0xff] }
  0x2f   :  { %1174 = vmatpush3.xpose.msk.msra.mxu0 %vm125_vm0, %v33_v49  ;;  %1212 = vmatpush3.xpose.msk.msra.mxu1 %vm125_vm0, %v77_v50  ;;  %v67_v21 = vld [vmem:[%s1811_s1] sm:$0xff] }
  0x30   :  { %1175 = vmatprep.subr.msk.mxu0 %vm125_vm0, %v48_v51  ;;  %1213 = vmatprep.subr.msk.mxu1 %vm125_vm0, %v92_v52 }
  0x33   :  { %1176 = vmatpush3.xpose.msk.msra.mxu0 %vm125_vm0, %v32_v53  ;;  %1214 = vmatpush3.xpose.msk.msra.mxu1 %vm125_vm0, %v76_v54 }
  0x34   :  { %1177 = vmatprep.subr.msk.mxu0 %vm125_vm0, %v47_v55  ;;  %1215 = vmatprep.subr.msk.mxu1 %vm125_vm0, %v91_v56 }
  0x37   :  { %1178 = vmatpush3.xpose.msk.msra.mxu0 %vm125_vm0, %v31_v57  ;;  %1216 = vmatpush3.xpose.msk.msra.mxu1 %vm125_vm0, %v75_v58 }
  0x38   :  { %1179 = vmatprep.subr.msk.mxu0 %vm125_vm0, %v46_v59  ;;  %1217 = vmatprep.subr.msk.mxu1 %vm125_vm0, %v90_v60 }
  0x3b   :  { %1180 = vmatpush3.xpose.msk.msra.mxu0 %vm125_vm0, %v30_v61  ;;  %1218 = vmatpush3.xpose.msk.msra.mxu1 %vm125_vm0, %v74_v62 }
  0x3c   :  { %1181 = vmatprep.subr.msk.mxu0 %vm125_vm0, %v45_v63  ;;  %1219 = vmatprep.subr.msk.mxu1 %vm125_vm0, %v89_v0 }
  0x3f   :  { %1182 = vmatpush3.xpose.msk.msra.mxu0 %vm125_vm0, %v29_v1  ;;  %1220 = vmatpush3.xpose.msk.msra.mxu1 %vm125_vm0, %v73_v2 }
  0x40   :  { %1221 = vmatprep.subr.msk.mxu1 %vm125_vm0, %v88_v3  ;;  %1277 = vmatprep.subr.msk.mxu0 %vm125_vm0, %v104_v4 }
  0x42   :  { %1184 = vmatmul.mubr.msk.f32.vlgmr.msra.gmra.mxu0 %vm125_vm0, %v1412_v9 }
  0x43   :  { %1222 = vmatpush3.xpose.msk.msra.mxu1 %vm125_vm0, %v72_v5  ;;  %1278 = vmatpush3.xpose.msk.msra.mxu0 %vm125_vm0, %v104_v4 }
  0x44   :  { %1223 = vmatprep.subr.msk.mxu1 %vm125_vm0, %v87_v6  ;;  %1279 = vmatprep.subr.msk.mxu0 %vm125_vm0, %v103_v7 }
  0x45   :  { %1185 = vmatprep.mubr.msk.f32.mxu0 %vm125_vm0, %v1473_v22 }
  0x46   :  { %1186 = vmatmul.mubr.msk.f32.gmra.mxu0 %vm125_vm0, %v1473_v22 }
  0x47   :  { %1224 = vmatpush3.xpose.msk.msra.mxu1 %vm125_vm0, %v71_v8  ;;  %1280 = vmatpush3.xpose.msk.msra.mxu0 %vm125_vm0, %v103_v7 }
  0x48   :  { %1225 = vmatprep.subr.msk.mxu1 %vm125_vm0, %v86_v10  ;;  %1281 = vmatprep.subr.msk.mxu0 %vm125_vm0, %v102_v11 }
  0x49   :  { %1187 = vmatprep.mubr.msk.f32.mxu0 %vm125_vm0, %v1512_v31 }
  0x4a   :  { %1188 = vmatmul.mubr.msk.f32.gmra.mxu0 %vm125_vm0, %v1512_v31 }
  0x4b   :  { %1226 = vmatpush3.xpose.msk.msra.mxu1 %vm125_vm0, %v70_v12  ;;  %1282 = vmatpush3.xpose.msk.msra.mxu0 %vm125_vm0, %v102_v11 }
  0x4c   :  { %1227 = vmatprep.subr.msk.mxu1 %vm125_vm0, %v85_v13  ;;  %1283 = vmatprep.subr.msk.mxu0 %vm125_vm0, %v101_v14 }
  0x4d   :  { %1189 = vmatprep.mubr.msk.f32.mxu0 %vm125_vm0, %v1499_v28 }
  0x4e   :  { %1190 = vmatmul.mubr.msk.f32.gmra.mxu0 %vm125_vm0, %v1499_v28 }
  0x4f   :  { %1228 = vmatpush3.xpose.msk.msra.mxu1 %vm125_vm0, %v69_v15  ;;  %1284 = vmatpush3.xpose.msk.msra.mxu0 %vm125_vm0, %v101_v14 }
  0x50   :  { %1229 = vmatprep.subr.msk.mxu1 %vm125_vm0, %v84_v16  ;;  %1285 = vmatprep.subr.msk.mxu0 %vm125_vm0, %v100_v17 }
  0x51   :  { %1289 = vmatprep.mubr.msk.f32.mxu0 %vm125_vm0, %v1412_v9 }
  0x53   :  { %1230 = vmatpush3.xpose.msk.msra.mxu1 %vm125_vm0, %v68_v18  ;;  %1286 = vmatpush3.xpose.msk.msra.mxu0 %vm125_vm0, %v100_v17 }
  0x54   :  { %1231 = vmatprep.subr.msk.mxu1 %vm125_vm0, %v83_v19  ;;  %1287 = vmatprep.subr.msk.mxu0 %vm125_vm0, %v99_v20 }
  0x57   :  { %1232 = vmatpush3.xpose.msk.msra.mxu1 %vm125_vm0, %v67_v21  ;;  %1288 = vmatpush3.xpose.msk.msra.mxu0 %vm125_vm0, %v99_v20 }
  0x5a   :  { %1234 = vmatmul.mubr.msk.f32.vlgmr.msra.gmra.mxu1 %vm125_vm0, %v1412_v9  ;;  %1290 = vmatmul.mubr.msk.f32.vlgmr.msra.gmra.mxu0 %vm125_vm0, %v1473_v22  ;;  %v1776_v9 = vld [vmem:[%s1814_s4] sm:$0xff] }
  0x5b   :  { %1235 = vmatprep.mubr.msk.f32.mxu1 %vm125_vm0, %v1473_v22  ;;  %1292 = vmatprep.mubr.msk.f32.mxu0 %vm125_vm0, %v1512_v31 }
  0x5e   :  { %1236 = vmatmul.mubr.msk.f32.gmra.mxu1 %vm125_vm0, %v1473_v22  ;;  %1293 = vmatmul.mubr.msk.f32.gmra.mxu0 %vm125_vm0, %v1499_v28  ;;  %v1344_v22 = vmov 0.0  }
  0x5f   :  { %1237 = vmatprep.mubr.msk.f32.mxu1 %vm125_vm0, %v1512_v31  ;;  %830 = vmatprep.mubr.f32.mxu0 %v1344_v22 }
  0x62   :  { %1238 = vmatmul.mubr.msk.f32.gmra.mxu1 %vm125_vm0, %v1512_v31 }
  0x63   :  { %1239 = vmatprep.mubr.msk.f32.mxu1 %vm125_vm0, %v1499_v28 }
  0x66   :  { %1240 = vmatmul.mubr.msk.f32.gmra.mxu1 %vm125_vm0, %v1499_v28 }
  0x67   :  { %1303 = vmatprep.mubr.msk.f32.mxu1 %vm125_vm0, %v1776_v9 }
  0x88   :  { %v113_v36 = vpop.permute.xlu1 %112 }
  0x99   :  { %v123_v33 = vpop.permute.xlu0 %122 }
  0x9c   :  { %v108_v45 = vpop.permute.xlu1 %107 }
  0x9d   :  { %v118_v39 = vpop.permute.xlu0 %117 }
  0xda   :  { %v1273_v29 = vpop.f32.mrf.mxu1 }
  0xdb   :  { %v413_v52 = vadd.f32 %v1273_v29, %v113_v36 }
  0xdc   :  { %v407_v30 = vpop.f32.mrf.mxu1 }
  0xdd   :  { %v408_v57 = vadd.f32 %v407_v30, %v108_v45  ;;  %v431_v0 = vmax.f32 %v413_v52, 0.0 }
  0xde   :  { %v1276_v32 = vpop.f32.mrf.mxu1 }
  0xdf   :  { %v423_v42 = vadd.f32 %v1276_v32, %v123_v33  ;;  %v428_v4 = vmax.f32 %v408_v57, 0.0 }
  0xe0   :  { %v417_v35 = vpop.f32.mrf.mxu1 }
  0xe1   :  { %v418_v46 = vadd.f32 %v417_v35, %v118_v39  ;;  %v437_v53 = vmax.f32 %v423_v42, 0.0 }
  0xe3   :  { %v434_v58 = vmax.f32 %v418_v46, 0.0 }
 0x102   :  { %v1781_v23 = vpop.f32.mrf.mxu0 }
 0x104   :  { %v1783_v24 = vpop.f32.mrf.mxu0 }
 0x106   :  { %v324_v25 = vpop.f32.mrf.mxu0 }
 0x107   :  { %v325_v8 = vadd.f32 %v324_v25, %v113_v36  ;;  %v751_v25 = vld [vmem:[%s1814_s4 + $0x8] sm:$0xff] }
 0x108   :  { %v326_v26 = vpop.f32.mrf.mxu0 }
 0x109   :  { %v327_v14 = vadd.f32 %v326_v26, %v113_v36 }
 0x10a   :  { %v330_v27 = vpop.f32.mrf.mxu0 }
 0x10b   :  { %v331_v11 = vadd.f32 %v330_v27, %v118_v39 }
 0x10c   :  { %v332_v28 = vpop.f32.mrf.mxu0 }
 0x10d   :  { %v333_v16 = vadd.f32 %v332_v28, %v118_v39  ;;  %v432_v26 = vmax.f32 %v331_v11, 0.0  ;;  %v752_v28 = vld [vmem:[%s1814_s4 + $0x10] sm:$0xff] }
 0x10e   :  { %v336_v31 = vpop.f32.mrf.mxu0 }
 0x10f   :  { %v337_v1 = vadd.f32 %v336_v31, %v123_v33 }
 0x110   :  { %v338_v34 = vpop.f32.mrf.mxu0 }
 0x111   :  { %v339_v5 = vadd.f32 %v338_v34, %v123_v33  ;;  %v435_v18 = vmax.f32 %v337_v1, 0.0 }
 0x113   :  { %v436_v29 = vmax.f32 %v339_v5, 0.0 }
 0x11a   :  { %v618_v37 = vpop.f32.mrf.mxu1  ;;  %v1291_v38 = vpop.f32.mrf.mxu0 }
 0x11b   :  { %v713_v47 = vadd.f32 %v1291_v38, %v113_v36  ;;  %v619_v27 = vadd.f32 %v618_v37, %v108_v45  ;;  %v430_v37 = vmax.f32 %v327_v14, 0.0 }
 0x11c   :  { %v620_v40 = vpop.f32.mrf.mxu1  ;;  %v707_v41 = vpop.f32.mrf.mxu0 }
 0x11d   :  { %v708_v54 = vadd.f32 %v707_v41, %v108_v45  ;;  %v731_v60 = vmax.f32 %v713_v47, 0.0  ;;  %v621_v30 = vadd.f32 %v620_v40, %v108_v45  ;;  %v429_v40 = vmax.f32 %v325_v8, 0.0 }
 0x11e   :  { %v624_v43 = vpop.f32.mrf.mxu1  ;;  %v1294_v44 = vpop.f32.mrf.mxu0  ;;  %v726_v46 = vmax.f32 %v619_v27, 0.0 }
 0x11f   :  { %v723_v48 = vadd.f32 %v1294_v44, %v123_v33  ;;  %v728_v2 = vmax.f32 %v708_v54, 0.0  ;;  %v743_v10 = vsub.f32 %v431_v0, %v731_v60  ;;  %v625_v20 = vadd.f32 %v624_v43, %v113_v36 }
 0x120   :  { %v626_v49 = vpop.f32.mrf.mxu1  ;;  %v717_v50 = vpop.f32.mrf.mxu0  ;;  %v727_v43 = vmax.f32 %v621_v30, 0.0 }
 0x121   :  { %v718_v51 = vadd.f32 %v717_v50, %v118_v39  ;;  %v737_v55 = vmax.f32 %v723_v48, 0.0  ;;  %v627_v15 = vadd.f32 %v626_v49, %v113_v36  ;;  %v740_v19 = vsub.f32 %v428_v4, %v728_v2 }
 0x122   :  { %v630_v56 = vpop.f32.mrf.mxu1  ;;  %v433_v36 = vmax.f32 %v333_v16, 0.0  ;;  %v729_v41 = vmax.f32 %v625_v20, 0.0 }
 0x123   :  { %v734_v59 = vmax.f32 %v718_v51, 0.0  ;;  %v749_v61 = vsub.f32 %v437_v53, %v737_v55  ;;  %v631_v12 = vadd.f32 %v630_v56, %v118_v39  ;;  %v730_v35 = vmax.f32 %v627_v15, 0.0 }
 0x124   :  { %v632_v62 = vpop.f32.mrf.mxu1  ;;  %v741_v49 = vsub.f32 %v429_v40, %v729_v41 }
 0x125   :  { %v746_v63 = vsub.f32 %v434_v58, %v734_v59  ;;  %1295 = vmatprep.subr.mxu1 %v749_v61  ;;  %v633_v6 = vadd.f32 %v632_v62, %v118_v39  ;;  %v732_v34 = vmax.f32 %v631_v12, 0.0  ;;  %v319_v39 = vadd.f32 %v1781_v23, %v108_v45 }
 0x126   :  { %v636_v3 = vpop.f32.mrf.mxu1  ;;  %1296 = vmatpush3.msra.mxu1 %v749_v61  ;;  %v742_v23 = vsub.f32 %v430_v37, %v730_v35 }
 0x127   :  { %v637_v7 = vadd.f32 %v636_v3, %v123_v33  ;;  %1297 = vmatprep.subr.mxu1 %v746_v63  ;;  %v733_v31 = vmax.f32 %v633_v6, 0.0  ;;  %v744_v47 = vsub.f32 %v432_v26, %v732_v34 }
 0x128   :  { %v638_v13 = vpop.f32.mrf.mxu1  ;;  %1298 = vmatpush3.msra.mxu1 %v746_v63 }
 0x129   :  { %v639_v17 = vadd.f32 %v638_v13, %v123_v33  ;;  %v735_v21 = vmax.f32 %v637_v7, 0.0  ;;  %1299 = vmatprep.subr.mxu1 %v743_v10  ;;  %v321_v33 = vadd.f32 %v1783_v24, %v108_v45  ;;  %v745_v44 = vsub.f32 %v433_v36, %v733_v31  ;;  %v753_v24 = vld [vmem:[%s1814_s4 + $0x18] sm:$0xff]  ;;  %s1346_s4 = smov [#allocation2]  }
 0x12a   :  { %1300 = vmatpush3.msra.mxu1 %v743_v10  ;;  %v426_v45 = vmax.f32 %v319_v39, 0.0  ;;  %s1043_s8 = sshll.u32 %s1346_s4, 4  ;;  %s1044_s8 = int_to_ptr.vmem [resolvable:$true] %s1043_s8 }
 0x12b   :  { %v736_v32 = vmax.f32 %v639_v17, 0.0  ;;  %1301 = vmatprep.subr.mxu1 %v740_v19  ;;  %v747_v42 = vsub.f32 %v435_v18, %v735_v21  ;;  %v427_v48 = vmax.f32 %v321_v33, 0.0  ;;  %s1321_s9 = scalar_lea.vmem %s1044_s8, 48  ;;  %s1325_s10 = scalar_lea.vmem %s1044_s8, 64 }
 0x12c   :  { %1302 = vmatpush3.msra.mxu1 %v740_v19  ;;  %v738_v51 = vsub.f32 %v426_v45, %v726_v46  ;;  %p1322_p0 = scmp.ne.s32.totalorder %s1044_s8, %s1321_s9  ;;  %p1326_p1 = scmp.lt.s32.totalorder %s1044_s8, %s1044_s8 }
 0x12d   :  { %v748_v38 = vsub.f32 %v436_v29, %v736_v32  ;;  %1304 = vmatmul.mubr.msk.f32.vlgmr.msra.gmra.mxu1 %vm125_vm0, %v751_v25  ;;  %v739_v50 = vsub.f32 %v427_v48, %v727_v43  ;;  %p1327_p2 = scmp.lt.s32.totalorder %s1325_s10, %s1321_s9 }
 0x12e   :  { %1306 = vmatprep.mubr.msk.f32.mxu1 %vm125_vm0, %v752_v28 }
 0x12f   :  { %790 = vmatprep.subr.mxu0 %v748_v38  ;;  %p1328_p3 = por %p1327_p2, %p1326_p1 }
 0x130   :  { %791 = vmatpush1.msra.mxu0 %v747_v42 }
 0x131   :  { %792 = vmatprep.subr.mxu0 %v745_v44  ;;  %1307 = vmatmul.mubr.msk.f32.gmra.mxu1 %vm125_vm0, %v753_v24  ;;  %p1329_p4 = pnand %p1328_p3, %p1322_p0 }
 0x132   :  { %793 = vmatpush1.msra.mxu0 %v744_v47  ;;  %v1012_v47 = vlaneseq }
 0x133   :  { %794 = vmatprep.subr.mxu0 %v742_v23 }
 0x134   :  { %795 = vmatpush1.msra.mxu0 %v741_v49  ;;  %v1013_v49 = vshrl.u32 %v1012_v47, 7  ;;  %vm1034_vm8 = vcmp.lt.s32.totalorder %v1012_v47, 300 }
 0x135   :  { %796 = vmatprep.subr.mxu0 %v739_v50 }
 0x136   :  { %797 = vmatpush1.msra.mxu0 %v738_v51 }
 0x137   :  { %1143 = vmatmul.mubr.msk.f32.vlgmr.msra.gmra.mxu0 %vm125_vm0, %v1776_v9 }
 0x138   :  { %836 = vmatprep.mubr.f32.mxu0 %v1344_v22 }
 0x13b   :  { %1144 = vmatmul.mubr.msk.f32.gmra.mxu0 %vm125_vm0, %v751_v25 }
 0x13c   :  { %842 = vmatprep.mubr.f32.mxu0 %v1344_v22 }
 0x13f   :  { %1145 = vmatmul.mubr.msk.f32.gmra.mxu0 %vm125_vm0, %v752_v28 }
 0x140   :  { %848 = vmatprep.mubr.f32.mxu0 %v1344_v22 }
 0x143   :  { %1146 = vmatmul.mubr.msk.f32.gmra.mxu0 %vm125_vm0, %v753_v24  ;;  %v1345_v24 = vmov 1966171168  }
 0x144   :  { %v1010_v46 = vunpack.c.l.s4 %v1345_v24 }
 0x146   :  { %v1011_v45 = vunpack.c.0.s8 %v1010_v46 }
 0x1ed   :  { %v1305_v52 = vpop.f32.mrf.mxu1 }
 0x1ee   :  { %v945_v53 = vmul.f32 %v1305_v52, %v1305_v52 }
 0x1ef   :  { %v921_v54 = vpop.f32.mrf.mxu1 }
 0x1f0   :  { %v972_v55 = vsel %vm970_vm1, %v945_v53, 0.0  ;;  %v942_v56 = vmul.f32 %v921_v54, %v921_v54 }
 0x1f1   :  { %v1308_v57 = vpop.f32.mrf.mxu1 }
 0x1f2   :  { %v971_v9 = vsel %vm970_vm1, %v942_v56, 0.0  ;;  %v951_v58 = vmul.f32 %v1308_v57, %v1308_v57  ;;  %v1014_v56 = vsub.s32 %v1011_v45, %v1013_v49 }
 0x1f3   :  { %v973_v59 = vadd.f32 %v972_v55, %v971_v9  ;;  %v931_v60 = vpop.f32.mrf.mxu1 }
 0x1f4   :  { %v948_v61 = vmul.f32 %v931_v60, %v931_v60  ;;  %v976_v62 = vsel %vm970_vm1, %v951_v58, 0.0 }
 0x1f6   :  { %v974_v63 = vsel %vm970_vm1, %v948_v61, 0.0 }
 0x1f7   :  { %v832_v0 = vpop.f32.mrf.mxu0  ;;  %v975_v1 = vadd.f32 %v974_v63, %v973_v59 }
 0x1f8   :  { %v940_v11 = vmul.f32 %v832_v0, %v832_v0 }
 0x1f9   :  { %v834_v2 = vpop.f32.mrf.mxu0  ;;  %v977_v22 = vadd.f32 %v976_v62, %v975_v1 }
 0x1fa   :  { %v941_v15 = vmul.f32 %v834_v2, %v834_v2 }
 0x1fb   :  { %v838_v3 = vpop.f32.mrf.mxu0  ;;  %v978_v4 = vrot.slane %v977_v22, 4 }
 0x1fc   :  { %v943_v7 = vmul.f32 %v838_v3, %v838_v3 }
 0x1fd   :  { %v840_v5 = vpop.f32.mrf.mxu0  ;;  %v979_v6 = vadd.f32 %v978_v4, %v977_v22 }
 0x1fe   :  { %v944_v12 = vmul.f32 %v840_v5, %v840_v5  ;;  %v952_v16 = vadd.f32 %v943_v7, %v940_v11 }
 0x1ff   :  { %v844_v8 = vpop.f32.mrf.mxu0  ;;  %v980_v10 = vrot.slane %v979_v6, 2 }
 0x200   :  { %v946_v13 = vmul.f32 %v844_v8, %v844_v8  ;;  %v961_v20 = vadd.f32 %v944_v12, %v941_v15 }
 0x201   :  { %v846_v14 = vpop.f32.mrf.mxu0  ;;  %v981_v19 = vadd.f32 %v980_v10, %v979_v6 }
 0x202   :  { %v947_v17 = vmul.f32 %v846_v14, %v846_v14  ;;  %v953_v21 = vadd.f32 %v952_v16, %v946_v13 }
 0x203   :  { %v850_v18 = vpop.f32.mrf.mxu0  ;;  %v982_v27 = vrot.slane %v981_v19, 1 }
 0x204   :  { %v949_v29 = vmul.f32 %v850_v18, %v850_v18  ;;  %v962_v31 = vadd.f32 %v961_v20, %v947_v17 }
 0x205   :  { %v852_v30 = vpop.f32.mrf.mxu0  ;;  %v983_v35 = vadd.f32 %v982_v27, %v981_v19 }
 0x206   :  { %v954_v32 = vadd.f32 %v953_v21, %v949_v29  ;;  %v950_v25 = vmul.f32 %v852_v30, %v852_v30 }
 0x207   :  { %1315 = vrsqrt.f32 %v983_v35  ;;  %vm1000_vm3 = vcmp.eq.f32.partialorder %v983_v35, inf  ;;  %v1003_v58 = vand.u32 2147483648, %v983_v35  ;;  %vm1002_vm7 = vcmp.eq.f32.partialorder %v983_v35, 0.0 }
 0x208   :  { %v955_v26 = vrot.slane %v954_v32, 4  ;;  %v963_v34 = vadd.f32 %v962_v31, %v950_v25 }
 0x20a   :  { %v956_v28 = vadd.f32 %v955_v26, %v954_v32  ;;  %v964_v33 = vrot.slane %v963_v34, 4 }
 0x20c   :  { %v957_v36 = vrot.slane %v956_v28, 2  ;;  %v965_v38 = vadd.f32 %v964_v33, %v963_v34 }
 0x20e   :  { %v958_v39 = vadd.f32 %v957_v36, %v956_v28  ;;  %v966_v40 = vrot.slane %v965_v38, 2 }
 0x210   :  { %v959_v41 = vrot.slane %v958_v39, 1  ;;  %v967_v42 = vadd.f32 %v966_v40, %v965_v38 }
 0x212   :  { %v960_v37 = vadd.f32 %v959_v41, %v958_v39  ;;  %v968_v43 = vrot.slane %v967_v42, 1 }
 0x214   :  { %1317 = vrsqrt.f32 %v960_v37  ;;  %v969_v44 = vadd.f32 %v968_v43, %v967_v42  ;;  %v1316_v48 = vpop.eup %1315  ;;  %vm986_vm2 = vcmp.eq.f32.partialorder %v960_v37, inf  ;;  %v989_v57 = vand.u32 2147483648, %v960_v37 }
 0x215   :  { %v999_v23 = vmul.f32 %v1316_v48, %v983_v35  ;;  %vm988_vm5 = vcmp.eq.f32.partialorder %v960_v37, 0.0 }
 0x216   :  { %1319 = vrsqrt.f32 %v969_v44  ;;  %vm993_vm4 = vcmp.eq.f32.partialorder %v969_v44, inf  ;;  %v996_v9 = vand.u32 2147483648, %v969_v44  ;;  %vm995_vm6 = vcmp.eq.f32.partialorder %v969_v44, 0.0 }
 0x217   :  { %v1001_v55 = vsel %vm1000_vm3, %v983_v35, %v999_v23 }
 0x218   :  { %v1004_v62 = vsel %vm1002_vm7, %v1003_v58, %v1001_v55 }
 0x219   :  { %v1022_v1 = vrot.slane %v1004_v62, %v1014_v56 }
 0x221   :  { %v1318_v50 = vpop.eup %1317 }
 0x222   :  { %v985_v51 = vmul.f32 %v1318_v50, %v960_v37 }
 0x223   :  { %v1320_v52 = vpop.eup %1319 }
 0x224   :  { %v987_v53 = vsel %vm986_vm2, %v960_v37, %v985_v51  ;;  %v992_v54 = vmul.f32 %v1320_v52, %v969_v44 }
 0x225   :  { %v990_v60 = vsel %vm988_vm5, %v989_v57, %v987_v53 }
 0x226   :  { %v994_v59 = vsel %vm993_vm4, %v969_v44, %v992_v54 }
 0x227   :  { %v997_v61 = vsel %vm995_vm6, %v996_v9, %v994_v59 }
 0x228   :  { %v1008_v63 = vcombine.low %v990_v60, %v997_v61 }
 0x22a   :  { %v1015_v0 = vrot.slane %v1008_v63, %v1014_v56 }
 0x22c   :  { %v1023_v2 = vcombine.low %v1015_v0, %v1022_v1 }
 0x22e   :  { %v1030_v22 = vrot.slane %v1023_v2, %v1014_v56 }
 0x230   :  { %1036 = vst.msk [vmem:[#allocation2] sm:$0x7] %vm1034_vm8, %v1030_v22 }
 0x231   :  { %1332 = shalt.err (!%p1329_p4)
}
 0x232   :  { %1046 = dma.vmem_to_hbm [thread:$0]  %s1044_s8, 48, %s1815_s5, [#allocation3]  }
 0x233   :  { %1341 = dma.done.wait [#allocation3], 48  }
 0x234   :  { %1342 = vsyncadd [#allocation3], 4294967248 }
 0x235   :  { %1050 = vsyncpa [#allocation3], 1 }

</bundles_post_ra>
